<compile_context>
chip_gen: v7x
topology: tpu7x:2x2x1
jax: 0.10.0
libtpu: 0.0.40
codegen_flags: <defaults>
</compile_context>

<pallas_src>
import functools

import jax
import jax.numpy as jnp
from jax.experimental import pallas as pl
from jax.experimental.pallas import tpu as pltpu

SUBLANE = 8               # second-to-last-dim alignment for row tiles
GRIDLESS_MAX_ROWS = 256   # below this: single gridless call, all VMEM-resident
TILE_M_MIN = 256          # row-tile bounds for the gridded path
TILE_M_MAX = 1024


def _round_up(n, m):
    return ((n + m - 1) // m) * m


# ---------------------------------------------------------------------------
# Kernel: fused MLP  (x @ W1 + b1 -> ReLU -> ... -> x @ Wn + bn)
# ---------------------------------------------------------------------------
def _fused_mlp_kernel(x_ref, *refs, n_layers):
    # refs = (w1, b1, w2, b2, ..., wn, bn, out)
    o_ref = refs[-1]
    h = x_ref[...]
    for i in range(n_layers):
        w_ref = refs[2 * i]
        b_ref = refs[2 * i + 1]
        h = jnp.dot(h, w_ref[...], preferred_element_type=jnp.float32)
        h = h + b_ref[...]
        if i != n_layers - 1:
            h = jnp.maximum(h, 0.0)
        # nn.Dropout is identity at inference time.
    o_ref[...] = h.astype(o_ref.dtype)


# ---------------------------------------------------------------------------
# Parameter preparation (done once, outside the hot path)
# ---------------------------------------------------------------------------
def init_mlp_params(key, input_size, hidden_layers, output_size, dtype=jnp.float32):
    """Deterministic parameter init (shapes match nn.Linear: W is (out, in))."""
    params = []
    sizes = [input_size] + list(hidden_layers) + [output_size]
    for i in range(len(sizes) - 1):
        fan_in, fan_out = sizes[i], sizes[i + 1]
        key, kw, kb = jax.random.split(key, 3)
        bound = 1.0 / jnp.sqrt(jnp.asarray(fan_in, dtype))
        w = jax.random.uniform(kw, (fan_out, fan_in), dtype, -bound, bound)
        b = jax.random.uniform(kb, (fan_out,), dtype, -bound, bound)
        params.append((w, b))
    return params


def prepare_params_for_kernel(params, compute_dtype=None):
    """One-time prep: transpose W -> (in, out), reshape bias -> (1, out).

    No zero-padding anywhere: intermediate activations never touch HBM, so
    narrow (masked) vector ops inside the kernel are cheaper than padded
    lanes plus extra wrapper-side HBM passes for this bytes/overhead-bound
    kernel.  Optionally cast to bf16 (accumulation stays f32 in the kernel).
    """
    prepared = []
    for w, b in params:
        w_t = jnp.asarray(w.T)                # (in, out)
        b_r = jnp.asarray(b).reshape(1, -1)   # (1, out)
        if compute_dtype is not None:
            w_t = w_t.astype(compute_dtype)
            b_r = b_r.astype(compute_dtype)
        prepared.append((w_t, b_r))
    return prepared


# ---------------------------------------------------------------------------
# pallas_call wrappers
# ---------------------------------------------------------------------------
def _pick_tile_m(rows):
    """Row tile for the gridded path: multiple of 8, within [256, 1024], picked
    so the grid length is even (>= 2) -> v7x's two TensorCores split the grid
    evenly.  On v5e/v6e (1 TC) this just amortizes per-step overhead."""
    n_tiles = 2 * max(1, pl.cdiv(rows, 2 * TILE_M_MAX))   # even, >= 2
    tile = _round_up(pl.cdiv(rows, n_tiles), SUBLANE)
    return max(TILE_M_MIN, min(TILE_M_MAX, tile))


def _fused_mlp_call(prepared_params, x2d, out_features):
    rows, in_features = x2d.shape
    n_layers = len(prepared_params)
    kernel = functools.partial(_fused_mlp_kernel, n_layers=n_layers)
    out_shape = jax.ShapeDtypeStruct((rows, out_features), x2d.dtype)

    flat_args = [x2d]
    for w_t, b_r in prepared_params:
        flat_args += [w_t, b_r]

    if rows <= GRIDLESS_MAX_ROWS:
        # Gridless: one kernel invocation, every operand fully VMEM-resident.
        vmem = pl.BlockSpec(memory_space=pltpu.MemorySpace.VMEM)
        return pl.pallas_call(
            kernel,
            out_shape=out_shape,
            in_specs=[vmem] * len(flat_args),
            out_specs=vmem,
        )(*flat_args)

    # Large batch: tile rows only.  x keeps its real (unpadded) feature width;
    # block last dim == full array dim is legal regardless of alignment.
    tile_m = _pick_tile_m(rows)
    in_specs = [pl.BlockSpec((tile_m, in_features), lambda i: (i, 0))]
    for w_t, b_r in prepared_params:
        # Constant index_map -> Pallas skips re-DMA after the first grid step.
        in_specs.append(pl.BlockSpec(w_t.shape, lambda i: (0, 0)))
        in_specs.append(pl.BlockSpec(b_r.shape, lambda i: (0, 0)))

    return pl.pallas_call(
        kernel,
        out_shape=out_shape,
        grid=(pl.cdiv(rows, tile_m),),   # last block may be partial: no dead rows
        in_specs=in_specs,
        out_specs=pl.BlockSpec((tile_m, out_features), lambda i: (i, 0)),
        compiler_params=pltpu.CompilerParams(
            # Rows are independent -> v7x's two TCs split the grid; inert on
            # v5e/v6e (single TC) but kept for portability.
            dimension_semantics=("parallel",),
            # Budgeted against v7x's 64 MiB physical VMEM (32 MiB scoped
            # default); a 1024-row f32 x-tile double-buffered is ~0.5 MiB here.
            vmem_limit_bytes=32 * 1024 * 1024,
        ),
    )(*flat_args)


@jax.jit
def mlp_forecaster_forward(prepared_params, x):
    """Replicates MLP_Forecaster.forward: flatten, then the fused Linear stack."""
    batch = x.shape[0]
    x_flat = x.reshape(batch, -1)              # x.view(x.size(0), -1)
    out_features = prepared_params[-1][0].shape[1]
    return _fused_mlp_call(prepared_params, x_flat, out_features)


def mlp_forecaster_reference(params, x):
    """Pure-JAX reference (torch-layout weights) for correctness check."""
    h = x.reshape(x.shape[0], -1)
    n_layers = len(params)
    for idx, (w, b) in enumerate(params):
        h = h @ w.T + b
        if idx != n_layers - 1:
            h = jnp.maximum(h, 0.0)
    return h


if __name__ == "__main__":
    key = jax.random.PRNGKey(0)
    key, kx = jax.random.split(key)

    # Small shapes: batch=2, channels=4, seq=16 -> input_size = 64
    batch, channels, seq = 2, 4, 16
    input_size = channels * seq
    hidden_layers = [32, 32]
    output_size = 8

    x = jax.random.normal(kx, (batch, channels, seq), dtype=jnp.float32)
    params = init_mlp_params(key, input_size, hidden_layers, output_size)
    prepared = prepare_params_for_kernel(params)   # one-time transpose

    out = jax.block_until_ready(mlp_forecaster_forward(prepared, x))
    ref = mlp_forecaster_reference(params, x)
    assert out.shape == (batch, output_size), out.shape
    # Tolerance accommodates the MXU's default f32 matmul precision
    # (bf16 multi-pass); any structural bug would produce O(0.1) errors.
    assert jnp.allclose(out, ref, atol=5e-3, rtol=5e-3), "mismatch vs reference (gridless path)"

    # Exercise the M-tiled path with a non-tile-multiple batch: the tile is
    # picked so the grid has 2 steps (last block partial) -> both v7x TCs work.
    key, kx2 = jax.random.split(key)
    big_batch = 600
    xb = jax.random.normal(kx2, (big_batch, channels, seq), dtype=jnp.float32)
    outb = jax.block_until_ready(mlp_forecaster_forward(prepared, xb))
    refb = mlp_forecaster_reference(params, xb)
    assert outb.shape == (big_batch, output_size), outb.shape
    assert jnp.allclose(outb, refb, atol=5e-3, rtol=5e-3), "mismatch vs reference (tiled path)"

    print("KERNEL_OK")
</pallas_src>

<mosaic_0001>
module attributes {stable_mosaic.version = 11 : i64} {
  func.func @_fused_mlp_kernel(%arg0: memref<2x64xf32, #tpu.memory_space<vmem>>, %arg1: memref<64x32xf32, #tpu.memory_space<vmem>>, %arg2: memref<1x32xf32, #tpu.memory_space<vmem>>, %arg3: memref<32x32xf32, #tpu.memory_space<vmem>>, %arg4: memref<1x32xf32, #tpu.memory_space<vmem>>, %arg5: memref<32x8xf32, #tpu.memory_space<vmem>>, %arg6: memref<1x8xf32, #tpu.memory_space<vmem>>, %arg7: memref<2x8xf32, #tpu.memory_space<vmem>>) attributes {dimension_semantics = [], scalar_prefetch = 0 : i64, scratch_operands = 0 : i64, tpu.core_type = #tpu.core_type<tc>} {
    %c0 = arith.constant 0 : index
    %c0_0 = arith.constant 0 : index
    %0 = vector.load %arg0[%c0, %c0_0] : memref<2x64xf32, #tpu.memory_space<vmem>>, vector<2x64xf32>
    %c0_1 = arith.constant 0 : index
    %c0_2 = arith.constant 0 : index
    %1 = vector.load %arg1[%c0_1, %c0_2] : memref<64x32xf32, #tpu.memory_space<vmem>>, vector<64x32xf32>
    %cst = arith.constant dense<0.000000e+00> : vector<2x32xf32>
    %2 = tpu.matmul %0, %1, %cst {dimension_numbers = #tpu.dot_dimension_numbers<[1], [0], [0], [1], [0, 0, 1, 1], [], []>} : vector<2x64xf32>, vector<64x32xf32>, vector<2x32xf32> -> vector<2x32xf32>
    %c0_3 = arith.constant 0 : index
    %c0_4 = arith.constant 0 : index
    %3 = vector.load %arg2[%c0_3, %c0_4] : memref<1x32xf32, #tpu.memory_space<vmem>>, vector<1x32xf32>
    %4 = vector.broadcast %3 : vector<1x32xf32> to vector<2x32xf32>
    %5 = arith.addf %2, %4 : vector<2x32xf32>
    %cst_5 = arith.constant 0.000000e+00 : f32
    %6 = vector.broadcast %cst_5 : f32 to vector<2x32xf32>
    %7 = arith.maximumf %5, %6 : vector<2x32xf32>
    %c0_6 = arith.constant 0 : index
    %c0_7 = arith.constant 0 : index
    %8 = vector.load %arg3[%c0_6, %c0_7] : memref<32x32xf32, #tpu.memory_space<vmem>>, vector<32x32xf32>
    %cst_8 = arith.constant dense<0.000000e+00> : vector<2x32xf32>
    %9 = tpu.matmul %7, %8, %cst_8 {dimension_numbers = #tpu.dot_dimension_numbers<[1], [0], [0], [1], [0, 0, 1, 1], [], []>} : vector<2x32xf32>, vector<32x32xf32>, vector<2x32xf32> -> vector<2x32xf32>
    %c0_9 = arith.constant 0 : index
    %c0_10 = arith.constant 0 : index
    %10 = vector.load %arg4[%c0_9, %c0_10] : memref<1x32xf32, #tpu.memory_space<vmem>>, vector<1x32xf32>
    %11 = vector.broadcast %10 : vector<1x32xf32> to vector<2x32xf32>
    %12 = arith.addf %9, %11 : vector<2x32xf32>
    %cst_11 = arith.constant 0.000000e+00 : f32
    %13 = vector.broadcast %cst_11 : f32 to vector<2x32xf32>
    %14 = arith.maximumf %12, %13 : vector<2x32xf32>
    %c0_12 = arith.constant 0 : index
    %c0_13 = arith.constant 0 : index
    %15 = vector.load %arg5[%c0_12, %c0_13] : memref<32x8xf32, #tpu.memory_space<vmem>>, vector<32x8xf32>
    %cst_14 = arith.constant dense<0.000000e+00> : vector<2x8xf32>
    %16 = tpu.matmul %14, %15, %cst_14 {dimension_numbers = #tpu.dot_dimension_numbers<[1], [0], [0], [1], [0, 0, 1, 1], [], []>} : vector<2x32xf32>, vector<32x8xf32>, vector<2x8xf32> -> vector<2x8xf32>
    %c0_15 = arith.constant 0 : index
    %c0_16 = arith.constant 0 : index
    %17 = vector.load %arg6[%c0_15, %c0_16] : memref<1x8xf32, #tpu.memory_space<vmem>>, vector<1x8xf32>
    %18 = vector.broadcast %17 : vector<1x8xf32> to vector<2x8xf32>
    %19 = arith.addf %16, %18 : vector<2x8xf32>
    %c0_17 = arith.constant 0 : index
    %c0_18 = arith.constant 0 : index
    %20 = vector.load %arg7[%c0_17, %c0_18] : memref<2x8xf32, #tpu.memory_space<vmem>>, vector<2x8xf32>
    tpu.vector_store %arg7[%c0_17, %c0_18], %19 {strides = array<i32>} : memref<2x8xf32, #tpu.memory_space<vmem>>, vector<2x8xf32>,
    return
  }
}

</mosaic_0001>

<bundles_post_ra>
// kernel: mlp_forecaster_forward.1
= control target key start
LH: loop header
LB: loop body
LE: loop exit
PB: predicated region body
PF: predicated region fallthrough
CT: control target
= control target key end

     0   :  { %v422_v3 = vmov 0.0|0.0   ;;  %vm423_vm0 = vmmov 0   ;;  %v424_v6 = vmov 0.0   ;;  %s543_s0 = inlined_call_operand.vmem [shape: f32[2,64], index: 0, kind: input, shape index: {}]   ;;  %s544_s1 = inlined_call_operand.vmem [shape: f32[64,32], index: 1, kind: input, shape index: {}]   ;;  %s545_s2 = inlined_call_operand.vmem [shape: f32[1,32], index: 2, kind: input, shape index: {}]   ;;  %s546_s3 = inlined_call_operand.vmem [shape: f32[32,32], index: 3, kind: input, shape index: {}]   ;;  %s547_s4 = inlined_call_operand.vmem [shape: f32[1,32], index: 4, kind: input, shape index: {}]   ;;  %s548_s5 = inlined_call_operand.vmem [shape: f32[32,8], index: 5, kind: input, shape index: {}]   ;;  %s549_s6 = inlined_call_operand.vmem [shape: f32[1,8], index: 6, kind: input, shape index: {}]   ;;  %s550_s7 = inlined_call_operand.hbm [shape: f32[2,8], index: 7, kind: output, shape index: {}]  }
   0x1   :  { %v28_v0 = vld [vmem:[%s544_s1] sm:$0xff]  ;;  %v29_v1 = vld [vmem:[%s544_s1 + $0x8] sm:$0xff]  ;;  %v30_v2 = vld [vmem:[%s544_s1 + $0x10] sm:$0xff]  ;;  %370 = vmatprep.subr.bf16.mxu0 %v422_v3  ;;  %345 = vmatprep.mubr.msk.f32.mxu0 %vm423_vm0, %v424_v6 }
   0x2   :  { %v371_v4 = vpack.c.bf16 %v29_v1, %v28_v0  ;;  %v31_v5 = vld [vmem:[%s544_s1 + $0x18] sm:$0xff]  ;;  %382 = vmatprep.subr.bf16.mxu1 %v422_v3  ;;  %356 = vmatprep.mubr.msk.f32.mxu1 %vm423_vm0, %v424_v6  ;;  %v118_v8 = vld [vmem:[%s546_s3] sm:$0xff]  ;;  %v119_v9 = vld [vmem:[%s546_s3 + $0x8] sm:$0xff] }
   0x3   :  { %v374_v7 = vpack.c.bf16 %v31_v5, %v30_v2  ;;  %v32_v10 = vld [vmem:[%s544_s1 + $0x20] sm:$0xff]  ;;  %v33_v11 = vld [vmem:[%s544_s1 + $0x28] sm:$0xff]  ;;  %v383_v12 = vpack.c.bf16 %v119_v9, %v118_v8 }
   0x4   :  { %372 = vmatpush3.bf16.msra.mxu0 %v371_v4 }
   0x5   :  { %373 = vmatprep.subr.bf16.mxu0 %v422_v3 }
   0x6   :  { %12 = vsyncpa [#allocation3], 0  ;;  %384 = vmatpush3.bf16.msra.mxu1 %v383_v12  ;;  %v377_v13 = vpack.c.bf16 %v33_v11, %v32_v10  ;;  %v34_v14 = vld [vmem:[%s544_s1 + $0x30] sm:$0xff]  ;;  %v35_v15 = vld [vmem:[%s544_s1 + $0x38] sm:$0xff]  ;;  %vm43_vm1 = vcmask 523264   ;;  %vm129_vm2 = vcmask 261120  }
   0x7   :  { %385 = vmatprep.subr.bf16.mxu1 %v422_v3  ;;  %v380_v16 = vpack.c.bf16 %v35_v15, %v34_v14  ;;  %v27_v17 = vld [vmem:[%s543_s0] sm:$0x3]  ;;  %v120_v18 = vld [vmem:[%s546_s3 + $0x10] sm:$0xff]  ;;  %v121_v19 = vld [vmem:[%s546_s3 + $0x18] sm:$0xff]  ;;  %s425_s14 = smov [#allocation2]   ;;  %vm288_vm3 = vcmask 58368  }
   0x8   :  { %375 = vmatpush3.bf16.msra.mxu0 %v374_v7  ;;  %v386_v20 = vpack.c.bf16 %v121_v19, %v120_v18  ;;  %v304_v21 = vld [vmem:[%s545_s2] ss:$0 sm:$0xff]  ;;  %v205_v23 = vld [vmem:[%s548_s5 + $0x8] sm:$0xff]  ;;  %v206_v29 = vld [vmem:[%s548_s5 + $0x10] sm:$0xff]  ;;  %s296_s15 = sshll.u32 %s425_s14, 4  ;;  %s297_s15 = int_to_ptr.vmem [resolvable:$true] %s296_s15 }
   0x9   :  { %376 = vmatprep.subr.bf16.mxu0 %v422_v3  ;;  %v204_v22 = vld [vmem:[%s548_s5] sm:$0xff]  ;;  %v207_v30 = vld [vmem:[%s548_s5 + $0x18] sm:$0xff]  ;;  %s398_s5 = scalar_lea.vmem %s297_s15, 32  ;;  %p403_p1 = scmp.lt.s32.totalorder %s297_s15, %s297_s15 }
   0xa   :  { %387 = vmatpush3.bf16.msra.mxu1 %v386_v20  ;;  %v389_v27 = vpack.c.bf16 %v205_v23, %v204_v22  ;;  %v392_v31 = vpack.c.bf16 %v207_v30, %v206_v29  ;;  %v306_v32 = vld [vmem:[%s547_s4] ss:$0 sm:$0xff]  ;;  %p399_p0 = scmp.ne.s32.totalorder %s297_s15, %s398_s5  ;;  %p404_p2 = scmp.lt.s32.totalorder %s398_s5, %s398_s5 }
   0xb   :  { %388 = vmatprep.subr.bf16.mxu1 %v422_v3  ;;  %v308_v37 = vld [vmem:[%s549_s6] ss:$0 sm:$0xff] }
   0xc   :  { %378 = vmatpush3.bf16.msra.mxu0 %v377_v13  ;;  %p405_p3 = por %p404_p2, %p403_p1 }
   0xd   :  { %379 = vmatprep.subr.bf16.mxu0 %v422_v3 }
   0xe   :  { %p406_p4 = pnand %p405_p3, %p399_p0 }
  0x10   :  { %381 = vmatpush3.bf16.msra.mxu0 %v380_v16 }
  0x13   :  { %346 = vmatmul.mubr.msk.f32.vlgmr.msra.gmra.mrb[0].mxu0 %vm43_vm1, %v27_v17 }
  0xe6   :  { %v113_v24 = vpop.f32.mrb[0].mxu0 }
  0xe7   :  { %v114_v25 = vadd.f32 %v304_v21, %v113_v24  ;;  %v347_v26 = vpop.f32.mrb[1].mxu0 }
  0xe9   :  { %v117_v28 = vmax.f32 %v114_v25, 0.0 }
  0xeb   :  { %357 = vmatmul.mubr.msk.f32.vlgmr.msra.gmra.mrb[0].mxu1 %vm129_vm2, %v117_v28 }
  0xec   :  { %390 = vmatpush3.bf16.msra.mxu1 %v389_v27  ;;  %367 = vmatprep.mubr.msk.f32.mxu1 %vm423_vm0, %v424_v6 }
  0xed   :  { %391 = vmatprep.subr.bf16.mxu1 %v422_v3 }
  0xf0   :  { %393 = vmatpush3.bf16.msra.mxu1 %v392_v31 }
 0x1be   :  { %v199_v33 = vpop.f32.mrb[0].mxu1 }
 0x1bf   :  { %v200_v34 = vadd.f32 %v306_v32, %v199_v33  ;;  %v358_v35 = vpop.f32.mrb[1].mxu1 }
 0x1c1   :  { %v203_v36 = vmax.f32 %v200_v34, 0.0 }
 0x1c3   :  { %368 = vmatmul.mubr.msk.f32.vlgmr.msra.gmra.mrb[2].mxu1 %vm129_vm2, %v203_v36 }
 0x296   :  { %v284_v38 = vpop.f32.mrb[2].mxu1 }
 0x297   :  { %v285_v39 = vadd.f32 %v308_v37, %v284_v38  ;;  %v369_v40 = vpop.f32.mrb[3].mxu1 }
 0x299   :  { %289 = vst.msk [vmem:[#allocation2] sm:$0x3] %vm288_vm3, %v285_v39 }
 0x29a   :  { %409 = shalt.err (!%p406_p4)
}
 0x29b   :  { %s410_s17 = scalar_lea.hbm %s550_s7, 32 }
 0x29c   :  { %p411_p5 = scmp.ne.s32.totalorder %s550_s7, %s410_s17  ;;  %p414_p6 = scmp.lt.u32.totalorder %s410_s17, %s550_s7 }
 0x29e   :  { %p416_p7 = pnand %p414_p6, %p411_p5 }
 0x2a0   :  { %419 = shalt.err (!%p416_p7)
}
 0x2a1   :  { %299 = dma.vmem_to_hbm [thread:$0]  %s297_s15, 32, %s550_s7, [#allocation3]  }
 0x2a2   :  { %420 = dma.done.wait [#allocation3], 32  }
 0x2a3   :  { %421 = vsyncadd [#allocation3], 4294967264 }
 0x2a4   :  { %303 = vsyncpa [#allocation3], 1 }

</bundles_post_ra>
